<compile_context>
chip_gen: v5e
topology: v5e:2x2
jax: 0.10.0
libtpu: 0.0.40
codegen_flags: <defaults>
</compile_context>

<pallas_src>
import jax
import jax.numpy as jnp
from jax.experimental import pallas as pl
from jax.experimental.pallas import tpu as pltpu


def _linear_kernel(x_ref, w_ref, b_ref, o_ref):
    # x_ref: (TILE_N, p) VMEM, w_ref: (1, p) VMEM, b_ref: (1, 1) SMEM,
    # o_ref: (TILE_N, 1) VMEM.
    prod = x_ref[...].astype(jnp.float32) * w_ref[...].astype(jnp.float32)
    acc = jnp.sum(prod, axis=-1, keepdims=True)          # XLU lane reduce
    o_ref[...] = (acc + b_ref[0, 0]).astype(o_ref.dtype)  # scalar bias broadcast


def _choose_tile_n(n, p, itemsize, max_tile_n, x_budget_bytes=24 * 1024 * 1024):
    """Largest multiple-of-8 row tile whose double buffer fits the budget."""
    rows_by_vmem = x_budget_bytes // (2 * p * itemsize)
    tile_n = max(8, (rows_by_vmem // 8) * 8)
    tile_n = min(tile_n, max_tile_n)
    n_pad8 = ((n + 7) // 8) * 8
    tile_n = min(tile_n, n_pad8)
    return max(8, tile_n)


def regression_model_forward(x, weight, bias, *, force_pallas=False,
                             max_tile_n=1024, small_threshold=4096):
    """x: (N, p) f32; weight: (1, p) f32 (PyTorch layout); bias: (1,) f32."""
    x = jnp.asarray(x, dtype=jnp.float32)
    weight = jnp.asarray(weight, dtype=jnp.float32).reshape(1, -1)
    bias2d = jnp.asarray(bias, dtype=jnp.float32).reshape(1, 1)
    n, p = x.shape

    # Tiny problems: Pallas fixed cost dwarfs the work; just use XLA.
    if not force_pallas and n * p < small_threshold:
        return x @ weight.T + bias2d

    tile_n = _choose_tile_n(n, p, x.dtype.itemsize, max_tile_n)
    num_tiles = -(-n // tile_n)
    n_pad = num_tiles * tile_n
    if n_pad != n:
        x_p = jnp.zeros((n_pad, p), x.dtype).at[:n].set(x)
    else:
        x_p = x

    # VMEM limit sized to the actual double-buffered working set (+headroom),
    # kept well under the per-TC scoped budget on every generation.
    x_bytes = 2 * tile_n * p * x.dtype.itemsize
    w_bytes = 2 * p * 4
    o_bytes = 2 * tile_n * 4
    vmem_limit = min(48 * 1024 * 1024,
                     max(4 * 1024 * 1024, 2 * (x_bytes + w_bytes + o_bytes)))

    out = pl.pallas_call(
        _linear_kernel,
        out_shape=jax.ShapeDtypeStruct((n_pad, 1), x.dtype),
        grid_spec=pltpu.PrefetchScalarGridSpec(
            num_scalar_prefetch=0,
            grid=(num_tiles,),
            in_specs=[
                pl.BlockSpec((tile_n, p), lambda i: (i, 0)),          # x tile stream
                pl.BlockSpec((1, p), lambda i: (0, 0)),               # weight row (resident)
                pl.BlockSpec(memory_space=pltpu.MemorySpace.SMEM),    # bias scalar
            ],
            out_specs=pl.BlockSpec((tile_n, 1), lambda i: (i, 0)),
        ),
        compiler_params=pltpu.CompilerParams(
            dimension_semantics=("parallel",),  # independent tiles -> megacore OK
            vmem_limit_bytes=int(vmem_limit),
        ),
    )(x_p, weight, bias2d)

    return out[:n]


if __name__ == "__main__":
    key = jax.random.PRNGKey(0)
    k_x, k_w, k_b = jax.random.split(key, 3)

    # Small but non-trivial shapes: batch N=200 (ragged vs. tile), feature p=128.
    N, P = 200, 128

    x = jax.random.normal(k_x, (N, P), dtype=jnp.float32)
    # Parameter init mimicking nn.Linear's uniform(-1/sqrt(p), 1/sqrt(p)).
    bound = 1.0 / (P ** 0.5)
    weight = jax.random.uniform(k_w, (1, P), minval=-bound, maxval=bound,
                                dtype=jnp.float32)
    bias = jax.random.uniform(k_b, (1,), minval=-bound, maxval=bound,
                              dtype=jnp.float32)

    # Force the Pallas path and a small tile so the multi-tile + ragged-pad
    # code path is exercised even at this toy size.
    y = regression_model_forward(x, weight, bias, force_pallas=True,
                                 max_tile_n=64)
    jax.block_until_ready(y)

    # Reference check (same semantics as torch nn.Linear).
    y_ref = x @ weight.T + bias
    assert y.shape == (N, 1)
    assert jnp.allclose(y, y_ref, atol=1e-5, rtol=1e-5)

    print("KERNEL_OK")
</pallas_src>

<mosaic_0001>
module attributes {stable_mosaic.version = 11 : i64} {
  func.func @_linear_kernel(%arg0: i32, %arg1: memref<64x128xf32, #tpu.memory_space<vmem>>, %arg2: memref<1x128xf32, #tpu.memory_space<vmem>>, %arg3: memref<1x1xf32, #tpu.memory_space<smem>>, %arg4: memref<64x1xf32, #tpu.memory_space<vmem>>) attributes {dimension_semantics = [#tpu.dimension_semantics<parallel>], iteration_bounds = array<i64: 4>, scalar_prefetch = 0 : i64, scratch_operands = 0 : i64, tpu.core_type = #tpu.core_type<tc>, window_params = [{transform_indices = @transform_0, window_bounds = array<i64: 64, 128>}, {pipeline_mode = #tpu.pipeline_mode<synchronous>, transform_indices = @transform_1, window_bounds = array<i64: 1, 128>}, {transform_indices = @transform_2, window_bounds = array<i64: 1, 1>}, {transform_indices = @transform_3, window_bounds = array<i64: 64, 1>}]} {
    %c0 = arith.constant 0 : index
    %c0_0 = arith.constant 0 : index
    %0 = vector.load %arg1[%c0, %c0_0] : memref<64x128xf32, #tpu.memory_space<vmem>>, vector<64x128xf32>
    %c0_1 = arith.constant 0 : index
    %c0_2 = arith.constant 0 : index
    %1 = vector.load %arg2[%c0_1, %c0_2] : memref<1x128xf32, #tpu.memory_space<vmem>>, vector<1x128xf32>
    %2 = vector.broadcast %1 : vector<1x128xf32> to vector<64x128xf32>
    %3 = arith.mulf %0, %2 : vector<64x128xf32>
    %cst = arith.constant dense<0.000000e+00> : vector<64xf32>
    %4 = vector.multi_reduction <add>, %3, %cst [1] : vector<64x128xf32> to vector<64xf32>
    %5 = vector.shape_cast %4 : vector<64xf32> to vector<64x1xf32>
    %c0_3 = arith.constant 0 : index
    %c0_4 = arith.constant 0 : index
    %6 = memref.load %arg3[%c0_3, %c0_4] : memref<1x1xf32, #tpu.memory_space<smem>>
    %7 = vector.broadcast %6 : f32 to vector<64x1xf32>
    %8 = arith.addf %5, %7 : vector<64x1xf32>
    %c0_5 = arith.constant 0 : index
    %c0_6 = arith.constant 0 : index
    %9 = vector.load %arg4[%c0_5, %c0_6] : memref<64x1xf32, #tpu.memory_space<vmem>>, vector<64x1xf32>
    tpu.vector_store %arg4[%c0_5, %c0_6], %8 {strides = array<i32>} : memref<64x1xf32, #tpu.memory_space<vmem>>, vector<64x1xf32>,
    return
  }
  func.func @transform_0(%arg0: i32) -> (i32, i32) {
    %c0_i32 = arith.constant 0 : i32
    %c0_i32_0 = arith.constant 0 : i32
    return %arg0, %c0_i32 : i32, i32
  }
  func.func @transform_1(%arg0: i32) -> (i32, i32) {
    %c0_i32 = arith.constant 0 : i32
    %c0_i32_0 = arith.constant 0 : i32
    %c0_i32_1 = arith.constant 0 : i32
    return %c0_i32, %c0_i32_0 : i32, i32
  }
  func.func @transform_2(%arg0: i32) -> (i32, i32) {
    %c0_i32 = arith.constant 0 : i32
    %c0_i32_0 = arith.constant 0 : i32
    %c0_i32_1 = arith.constant 0 : i32
    return %c0_i32, %c0_i32_0 : i32, i32
  }
  func.func @transform_3(%arg0: i32) -> (i32, i32) {
    %c0_i32 = arith.constant 0 : i32
    %c0_i32_0 = arith.constant 0 : i32
    return %arg0, %c0_i32 : i32, i32
  }
}

</mosaic_0001>

<bundles_post_ra>
// kernel: tpu_custom_call.1
= control target key start
LH: loop header
LB: loop body
LE: loop exit
PB: predicated region body
PF: predicated region fallthrough
CT: control target
= control target key end

     0   :  { %s567_s0 = inlined_call_operand.hbm [shape: f32[256,128], index: 0, kind: input, shape index: {}]   ;;  %s568_s1 = inlined_call_operand.vmem [shape: f32[1,128], index: 1, kind: input, shape index: {}]   ;;  %s569_s2 = inlined_call_operand.<no memory space> [shape: f32[1,1], index: 2, kind: input, shape index: {}]   ;;  %s570_s3 = inlined_call_operand.vmem [shape: f32[256,1], index: 3, kind: output, shape index: {}]  }
   0x1   :  { %8 = sst [smem:[#allocation2]] %s569_s2 }
   0x2   :  { %9 = vsyncpa [#allocation4], 0 }
   0x3   :  { %11 = vsyncpa [#allocation4 + $0x1], 0  ;;  %s465_s14 = smov 0   ;;  %s467_s15 = smov 0  }
   0x4   :  { %s469_s16 = smov 0   ;;  %s471_s17 = smov 0  }
   0x5 LB: > { %s318_s2 = sadd.s32 4294967295, %s438_s17   ;;  %s485_s18 = sadd.s32 1, %s438_s17   ;;  %s438_s17 = sphi %s471_s17, %s577_s17   ;;  %s434_s16 = sphi %s469_s16, %s576_s16   ;;  %s430_s15 = sphi %s467_s15, %s575_s15   ;;  %s426_s14 = sphi %s465_s14, %s574_s14  }
   0x6   : > { %s21_s19 = ssub.s32 %s438_s17, %s485_s18  ;;  %s24_s20 = sadd.s32 1, %s434_s16 }
   0x7   : > { %p22_p0 = scmp.eq.s32.totalorder %s21_s19, 0  ;;  %p31_p1 = scmp.ne.s32.totalorder %s434_s16, %s430_s15 }
   0x8   : > { %p32_p2 = scmp.eq.s32.totalorder %s438_s17, 0  ;;  %p37_p3 = scmp.ne.s32.totalorder %s430_s15, %s426_s14 }
   0x9   : > { %s495_s21 = scalar_select %p22_p0, %s434_s16, %s24_s20  }
   0xa   : > { %p497_p4 = por %p32_p2, %p31_p1  ;;  %p38_p5 = scmp.eq.s32.totalorder %s318_s2, 0 }
   0xb   : > { %p338_p6 = scmp.lt.s32.totalorder %s438_s17, 4  ;;  %s135_s24 = sand.u32 1, %s434_s16  }
   0xc   : > { %p504_p7 = por %p38_p5, %p37_p3  ;;  %s322_s25 = sshll.u32 %s135_s24, 6 }
   0xd   : > { %s331_s26 = sshll.u32 %s438_s17, 6  ;;  %s139_s30 = scalar_lea.vmem [#allocation3], %s322_s25 }
   0xe   : > { %s144_s29 = scalar_lea.hbm %s567_s0, %s331_s26  ;;  %s147_s4 = sshll.u32 %s139_s30, 4  ;;  %s148_s4 = int_to_ptr.vmem [resolvable:$true] %s147_s4 }
   0xf   : > { %s145_s5 = sshll.u32 %s144_s29, 4  ;;  %p515_p8 = pnand %p338_p6, %p497_p4  ;;  %s146_s5 = int_to_ptr.hbm [resolvable:$true] %s145_s5 }
  0x10   : > { %p325_p9 = scmp.ge.s32.totalorder %s438_s17, 1  ;;  %s136_s7 = scalar_lea.sflag [#allocation4], %s135_s24 }
  0x11   : > { %s374_s8 = sshra.s32 %s146_s5, 4  ;;  %p378_p11 = pneg %p515_p8  ;;  %s375_s8 = int_to_ptr.hbm [resolvable:$true] %s374_s8 }
  0x12   : > { %s376_s9 = scalar_lea.hbm %s375_s8, 64  ;;  %s381_s12 = scalar_lea.hbm %s567_s0, 256 }
  0x13   : > { %p377_p10 = scmp.ne.s32.totalorder %s375_s8, %s376_s9  ;;  %p382_p0 = scmp.lt.s32.totalorder %s375_s8, %s567_s0 }
  0x14   : > { %p383_p1 = scmp.lt.s32.totalorder %s381_s12, %s376_s9 }
  0x15   : > { %p379_p12 = pnand %p378_p11, %p377_p10 }
  0x16   : > { %p384_p2 = por %p383_p1, %p382_p0 }
  0x17   : > { %p380_p13 = pneg %p379_p12 }
  0x19   : > { %p385_p3 = pnand %p384_p2, %p380_p13 }
  0x1b   : > { %388 = shalt.err (!%p385_p3)
}
  0x1c   : > { %s440_s19 = smov 128   ;;  %s441_s20 = smov 8  }
  0x1d   : > { %337 = dma.hbm_to_vmem [thread:$0]  (!%p515_p8), %s146_s5, 1024, %s148_s4, %s136_s7, %s440_s19, %s440_s19, %s441_s20  }
  0x1e   : > { %p155_p4 = scmp.lt.s32.totalorder %s438_s17, 5 }
  0x20   : > { %p156_p5 = pnand %p325_p9, %p155_p4 }
  0x21   : > { %s161_s22 = sand.u32 (!%p156_p5), 1, %s430_s15  }
  0x22   : > { %159 = sbr.rel (%p156_p5) target bundleno = 179 (0xb3), region = 32  ;;  %s326_s24 = sshll.u32 (!%p156_p5), %s161_s22, 6 }
  0x23   : > { %s162_s25 = scalar_lea.sflag (!%p156_p5), [#allocation4], %s161_s22  ;;  %s165_s26 = scalar_lea.vmem (!%p156_p5), [#allocation3], %s326_s24 }
  0x27   : > { %421 = dma.done.wait (%p504_p7), %s162_s25, 1024  }
  0x28   : > { %423 = vsyncadd (%p504_p7), %s162_s25, 4294966272  ;;  %v198_v0 = vld [vmem:[%s165_s26 + $0x10] sm:$0xff]  ;;  %v373_v1 = vld [vmem:[%s568_s1] ss:$0 sm:$0xff]  ;;  %s327_s23 = sshll.u32 %s318_s2, 3  ;;  %s232_s29 = sld [smem:[#allocation2]] }
  0x29   : > { %v196_v2 = vld [vmem:[%s165_s26] sm:$0xff]  ;;  %v210_v4 = vmul.f32 %v373_v1, %v198_v0  ;;  %v199_v7 = vld [vmem:[%s165_s26 + $0x18] sm:$0xff]  ;;  %v197_v8 = vld [vmem:[%s165_s26 + $0x8] sm:$0xff]  ;;  %p191_p6 = scmp.lt.s32.totalorder %s327_s23, 31  ;;  %vm242_vm0 = vcmask 7168  }
  0x2a   : > { %v200_v3 = vld [vmem:[%s165_s26 + $0x20] sm:$0xff]  ;;  %v208_v5 = vmul.f32 %v373_v1, %v196_v2  ;;  %v201_v9 = vld [vmem:[%s165_s26 + $0x28] sm:$0xff]  ;;  %v211_v10 = vmul.f32 %v373_v1, %v199_v7  ;;  %v209_v11 = vmul.f32 %v373_v1, %v197_v8  ;;  %v203_v13 = vld [vmem:[%s165_s26 + $0x38] sm:$0xff] }
  0x2b   : > { %v212_v6 = vmul.f32 %v373_v1, %v200_v3  ;;  %220 = vadd.xlane.f32.xlu1 %v210_v4  ;;  %v213_v12 = vmul.f32 %v373_v1, %v201_v9  ;;  %v202_v14 = vld [vmem:[%s165_s26 + $0x30] sm:$0xff]  ;;  %v215_v15 = vmul.f32 %v373_v1, %v203_v13  ;;  %s579_s23 = smov (!%p191_p6, %s327_s23), 31 }
  0x2c   : > { %216 = vadd.xlane.f32.xlu0 %v208_v5  ;;  %v214_v16 = vmul.f32 %v373_v1, %v202_v14  ;;  %s328_s30 = sshll.u32 %s579_s23, 3 }
  0x2d   : > { %224 = vadd.xlane.f32.xlu2 %v212_v6  ;;  %s194_s6 = scalar_lea.vmem %s570_s3, %s328_s30 }
  0x2e   : > { %v233_v17 = vstv %s232_s29 }
  0x33   : > { %222 = vadd.xlane.f32.xlu1 %v211_v10 }
  0x34   : > { %218 = vadd.xlane.f32.xlu0 %v209_v11 }
  0x35   : > { %226 = vadd.xlane.f32.xlu2 %v213_v12 }
  0x3b   : > { %230 = vadd.xlane.f32.xlu1 %v215_v15 }
  0x3c   : > { %228 = vadd.xlane.f32.xlu0 %v214_v16 }
  0x9e   : > { %v221_v18 = vpop.xlane.xlu1 %220 }
  0x9f   : > { %v217_v19 = vpop.xlane.xlu0 %216  ;;  %v236_v20 = vadd.f32 %v233_v17, %v221_v18 }
  0xa0   : > { %v234_v21 = vadd.f32 %v233_v17, %v217_v19  ;;  %v225_v22 = vpop.xlane.xlu2 %224 }
  0xa1   : > { %v238_v23 = vadd.f32 %v233_v17, %v225_v22  ;;  %245 = vst.msk [vmem:[%s194_s6 + $0x10] sm:$0xff] %vm242_vm0, %v236_v20 }
  0xa2   : > { %243 = vst.msk [vmem:[%s194_s6] sm:$0xff] %vm242_vm0, %v234_v21 }
  0xa3   : > { %247 = vst.msk [vmem:[%s194_s6 + $0x20] sm:$0xff] %vm242_vm0, %v238_v23 }
  0xa6   : > { %v223_v24 = vpop.xlane.xlu1 %222 }
  0xa7   : > { %v219_v25 = vpop.xlane.xlu0 %218  ;;  %v237_v26 = vadd.f32 %v233_v17, %v223_v24 }
  0xa8   : > { %v235_v27 = vadd.f32 %v233_v17, %v219_v25  ;;  %v227_v28 = vpop.xlane.xlu2 %226 }
  0xa9   : > { %v239_v29 = vadd.f32 %v233_v17, %v227_v28  ;;  %246 = vst.msk [vmem:[%s194_s6 + $0x18] sm:$0xff] %vm242_vm0, %v237_v26 }
  0xaa   : > { %244 = vst.msk [vmem:[%s194_s6 + $0x8] sm:$0xff] %vm242_vm0, %v235_v27 }
  0xab   : > { %248 = vst.msk [vmem:[%s194_s6 + $0x28] sm:$0xff] %vm242_vm0, %v239_v29 }
  0xae   : > { %v231_v30 = vpop.xlane.xlu1 %230 }
  0xaf   : > { %v229_v31 = vpop.xlane.xlu0 %228  ;;  %v241_v32 = vadd.f32 %v233_v17, %v231_v30 }
  0xb0   : > { %v240_v33 = vadd.f32 %v233_v17, %v229_v31 }
  0xb1   : > { %250 = vst.msk [vmem:[%s194_s6 + $0x38] sm:$0xff] %vm242_vm0, %v241_v32 }
  0xb2   : > { %249 = vst.msk [vmem:[%s194_s6 + $0x30] sm:$0xff] %vm242_vm0, %v240_v33 }
  0xb3 PF: > { %p14_p7 = scmp.ge.s32.totalorder %s485_s18, 6   ;;  %s574_s14 = smov %s430_s15 }
  0xb4   : > { %s575_s15 = smov %s434_s16  ;;  %s576_s16 = smov %s495_s21 }
  0xb5   : > { %s577_s17 = smov %s485_s18  ;;  %16 = sbr.rel (!%p14_p7) target bundleno = 5 (0x5), region = 72 }
  0xba   :  { %273 = vsyncpa [#allocation4], 1 }
  0xbb   :  { %275 = vsyncpa [#allocation4 + $0x1], 1 }

</bundles_post_ra>
